<compile_context>
chip_gen: v6e
topology: v6e:2x2x1
jax: 0.10.0
libtpu: 0.0.40
codegen_flags: <defaults>
</compile_context>

<pallas_src>
import functools

import jax
import jax.numpy as jnp
from jax.experimental import pallas as pl
from jax.experimental.pallas import tpu as pltpu


# ------------------------------ kernels ------------------------------------


def _propagator_kernel_nores(x_ref, w_ref, b_ref, o_ref, *, compute_dtype):
    # x_ref: [TM, D], w_ref: [D, O] (pre-transposed, pre-cast), b_ref: [1, O]
    x = x_ref[...]
    if compute_dtype is not None and x.dtype != compute_dtype:
        x = x.astype(compute_dtype)              # streamed cast, hides under DMA
    y = jnp.dot(x, w_ref[...], preferred_element_type=jnp.float32)
    y = y + b_ref[...]                           # broadcast [1, O] over rows
    o_ref[...] = jnp.maximum(y, 0.0).astype(o_ref.dtype)


def _propagator_kernel_res(x_ref, w_ref, b_ref, r_ref, o_ref, *, compute_dtype):
    # Same as above plus residual add (r_ref: [TM, O]).
    x = x_ref[...]
    if compute_dtype is not None and x.dtype != compute_dtype:
        x = x.astype(compute_dtype)
    y = jnp.dot(x, w_ref[...], preferred_element_type=jnp.float32)
    y = y + b_ref[...] + r_ref[...]              # promotes to f32 if res is bf16
    o_ref[...] = jnp.maximum(y, 0.0).astype(o_ref.dtype)


# ------------------------------ tiling -------------------------------------


def _round_up(x, m):
    return (x + m - 1) // m * m


def _vmem_capacity_bytes():
    try:
        return int(pltpu.get_tpu_info().vmem_capacity_bytes)
    except Exception:
        return 64 << 20            # conservative (v7x per-TC physical VMEM)


def _choose_tiling(M, D, O, has_res, x_isz, o_isz, r_isz):
    """Pick (TM, vmem_limit_bytes): TM multiple of 8, blocks near-equal,
    >=2 grid steps when M >= 16 (v7x megacore), double-buffered tiles +
    resident weight/bias within a generation-aware VMEM budget."""
    vmem_cap = _vmem_capacity_bytes()
    budget = vmem_cap // 2                              # headroom for compiler scratch
    resident = 2 * (D * O * 4 + O * 4)                  # weight + bias, 2x-buffered
    avail = max(budget - resident, 1 << 20)
    per_row = 2 * (D * x_isz + O * o_isz + (O * r_isz if has_res else 0))

    tm = max(min(avail // max(per_row, 1), 8192), 8)    # bytes-driven, multi-MiB/step
    tm = (tm // 8) * 8
    tm = min(tm, _round_up(M, 8))

    # Rebalance: near-equal blocks, and >= 2 steps so both v7x TCs get work.
    nsteps = pl.cdiv(M, tm)
    if nsteps < 2 and M >= 16:
        nsteps = 2
    tm = max(_round_up(pl.cdiv(M, nsteps), 8), 8)

    needed = tm * per_row + resident
    vmem_limit = int(min(max(2 * needed, 32 << 20), vmem_cap * 3 // 4))
    return tm, vmem_limit


# ------------------------------ wrapper ------------------------------------


@functools.partial(jax.jit, static_argnames=("compute_dtype", "out_dtype"))
def propagator_forward(x, weight, bias, res=None, *, compute_dtype=None,
                       out_dtype=None):
    """Pallas Propagator forward.

    Args:
      x:      [B, N, input_size]
      weight: [output_size, input_size]  (PyTorch nn.Linear layout)
      bias:   [output_size]
      res:    optional [B, N, output_size] residual branch
      compute_dtype: optional matmul-input dtype (e.g. jnp.bfloat16) for the
                     MXU fast path; accumulation/epilogue stay f32.
      out_dtype: output dtype (defaults to x.dtype).

    Returns:
      [B, N, output_size]
    """
    B, N, D = x.shape
    O, D_w = weight.shape
    assert D_w == D, (D_w, D)
    M = B * N
    has_res = res is not None
    out_dtype = x.dtype if out_dtype is None else out_dtype

    x2 = x.reshape(M, D)
    b2 = bias.reshape(1, O).astype(jnp.float32)
    # One-time weight transpose (+ optional cast) in the wrapper: amortized over
    # the whole grid, guarantees no per-step in-kernel transpose of the
    # resident operand.
    w = weight.T
    if compute_dtype is not None:
        w = w.astype(compute_dtype)

    r_isz = res.dtype.itemsize if has_res else 0
    TM, vmem_limit = _choose_tiling(
        M, D, O, has_res,
        x_isz=x.dtype.itemsize,
        o_isz=jnp.dtype(out_dtype).itemsize,
        r_isz=r_isz)

    grid = (pl.cdiv(M, TM),)                        # ragged last block handled by Pallas
    x_spec = pl.BlockSpec((TM, D), lambda i: (i, 0))
    w_spec = pl.BlockSpec((D, O), lambda i: (0, 0))  # resident
    b_spec = pl.BlockSpec((1, O), lambda i: (0, 0))  # resident
    o_spec = pl.BlockSpec((TM, O), lambda i: (i, 0))

    out_shape = jax.ShapeDtypeStruct((M, O), out_dtype)
    compiler_params = pltpu.CompilerParams(
        dimension_semantics=("parallel",),           # megacore sharding on v7x
        vmem_limit_bytes=vmem_limit)

    if not has_res:
        out = pl.pallas_call(
            functools.partial(_propagator_kernel_nores,
                              compute_dtype=compute_dtype),
            out_shape=out_shape,
            grid=grid,
            in_specs=[x_spec, w_spec, b_spec],
            out_specs=o_spec,
            compiler_params=compiler_params,
        )(x2, w, b2)
    else:
        r2 = res.reshape(M, O)
        kwargs = {}
        if r2.dtype == out_dtype:
            # Safe: identical block shape/index map for r and out (tile i is
            # fully read before tile i is written; tiles are disjoint).
            kwargs["input_output_aliases"] = {3: 0}
        out = pl.pallas_call(
            functools.partial(_propagator_kernel_res,
                              compute_dtype=compute_dtype),
            out_shape=out_shape,
            grid=grid,
            in_specs=[x_spec, w_spec, b_spec, o_spec],
            out_specs=o_spec,
            compiler_params=compiler_params,
            **kwargs,
        )(x2, w, b2, r2)

    return out.reshape(B, N, O)


# ------------------------------ reference ----------------------------------


def _reference_forward(x, weight, bias, res=None):
    B, N, D = x.shape
    O = weight.shape[0]
    y = x.reshape(B * N, D) @ weight.T + bias
    if res is not None:
        y = y + res.reshape(B * N, O)
    y = jnp.maximum(y, 0.0)
    return y.reshape(B, N, O)


if __name__ == "__main__":
    # Small shapes consistent with the module: batch=2, n_relations=8,
    # input_size=32, output_size=32.
    B, N, input_size, output_size = 2, 8, 32, 32

    key = jax.random.PRNGKey(0)
    kx, kw, kb, kr = jax.random.split(key, 4)

    x = jax.random.normal(kx, (B, N, input_size), dtype=jnp.float32)
    weight = jax.random.normal(kw, (output_size, input_size), dtype=jnp.float32) * 0.1
    bias = jax.random.normal(kb, (output_size,), dtype=jnp.float32) * 0.1
    res = jax.random.normal(kr, (B, N, output_size), dtype=jnp.float32)

    # Non-residual path (f32 matmul).
    out0 = jax.block_until_ready(propagator_forward(x, weight, bias))
    ref0 = _reference_forward(x, weight, bias)
    assert out0.shape == (B, N, output_size)
    assert jnp.allclose(out0, ref0, atol=1e-5, rtol=1e-5)

    # Residual path (f32 matmul, aliased res buffer).
    out1 = jax.block_until_ready(propagator_forward(x, weight, bias, res=res))
    ref1 = _reference_forward(x, weight, bias, res=res)
    assert out1.shape == (B, N, output_size)
    assert jnp.allclose(out1, ref1, atol=1e-5, rtol=1e-5)

    # bf16 MXU fast path (f32 accumulate) — looser tolerance.
    out_bf = jax.block_until_ready(
        propagator_forward(x, weight, bias, res=res, compute_dtype=jnp.bfloat16))
    assert out_bf.shape == (B, N, output_size)
    assert jnp.allclose(out_bf, ref1, atol=5e-2, rtol=5e-2)

    # Ragged multi-step grid (M=750 -> 2 near-equal blocks, last one masked,
    # no padding pass, res<->out alias live).
    B2, N2 = 3, 250
    k1, k2 = jax.random.split(kr)
    x_big = jax.random.normal(k1, (B2, N2, input_size), dtype=jnp.float32)
    res_big = jax.random.normal(k2, (B2, N2, output_size), dtype=jnp.float32)
    out2 = jax.block_until_ready(
        propagator_forward(x_big, weight, bias, res=res_big))
    ref2 = _reference_forward(x_big, weight, bias, res=res_big)
    assert out2.shape == (B2, N2, output_size)
    assert jnp.allclose(out2, ref2, atol=1e-4, rtol=1e-4)

    print("KERNEL_OK")
</pallas_src>

<mosaic_0001>
module attributes {stable_mosaic.version = 11 : i64} {
  func.func @_propagator_kernel_nores(%arg0: i32, %arg1: memref<8x32xf32, #tpu.memory_space<vmem>>, %arg2: memref<32x32xf32, #tpu.memory_space<vmem>>, %arg3: memref<1x32xf32, #tpu.memory_space<vmem>>, %arg4: memref<8x32xf32, #tpu.memory_space<vmem>>) attributes {dimension_semantics = [#tpu.dimension_semantics<parallel>], iteration_bounds = array<i64: 2>, scalar_prefetch = 0 : i64, scratch_operands = 0 : i64, tpu.core_type = #tpu.core_type<tc>, window_params = [{transform_indices = @transform_0, window_bounds = array<i64: 8, 32>}, {pipeline_mode = #tpu.pipeline_mode<synchronous>, transform_indices = @transform_1, window_bounds = array<i64: 32, 32>}, {pipeline_mode = #tpu.pipeline_mode<synchronous>, transform_indices = @transform_2, window_bounds = array<i64: 1, 32>}, {transform_indices = @transform_3, window_bounds = array<i64: 8, 32>}]} {
    %c0 = arith.constant 0 : index
    %c0_0 = arith.constant 0 : index
    %0 = vector.load %arg1[%c0, %c0_0] : memref<8x32xf32, #tpu.memory_space<vmem>>, vector<8x32xf32>
    %c0_1 = arith.constant 0 : index
    %c0_2 = arith.constant 0 : index
    %1 = vector.load %arg2[%c0_1, %c0_2] : memref<32x32xf32, #tpu.memory_space<vmem>>, vector<32x32xf32>
    %cst = arith.constant dense<0.000000e+00> : vector<8x32xf32>
    %2 = tpu.matmul %0, %1, %cst {dimension_numbers = #tpu.dot_dimension_numbers<[1], [0], [0], [1], [0, 0, 1, 1], [], []>} : vector<8x32xf32>, vector<32x32xf32>, vector<8x32xf32> -> vector<8x32xf32>
    %c0_3 = arith.constant 0 : index
    %c0_4 = arith.constant 0 : index
    %3 = vector.load %arg3[%c0_3, %c0_4] : memref<1x32xf32, #tpu.memory_space<vmem>>, vector<1x32xf32>
    %4 = vector.broadcast %3 : vector<1x32xf32> to vector<8x32xf32>
    %5 = arith.addf %2, %4 : vector<8x32xf32>
    %cst_5 = arith.constant 0.000000e+00 : f32
    %6 = vector.broadcast %cst_5 : f32 to vector<8x32xf32>
    %7 = arith.maximumf %5, %6 : vector<8x32xf32>
    %c0_6 = arith.constant 0 : index
    %c0_7 = arith.constant 0 : index
    %8 = vector.load %arg4[%c0_6, %c0_7] : memref<8x32xf32, #tpu.memory_space<vmem>>, vector<8x32xf32>
    tpu.vector_store %arg4[%c0_6, %c0_7], %7 {strides = array<i32>} : memref<8x32xf32, #tpu.memory_space<vmem>>, vector<8x32xf32>,
    return
  }
  func.func @transform_0(%arg0: i32) -> (i32, i32) {
    %c0_i32 = arith.constant 0 : i32
    %c0_i32_0 = arith.constant 0 : i32
    return %arg0, %c0_i32 : i32, i32
  }
  func.func @transform_1(%arg0: i32) -> (i32, i32) {
    %c0_i32 = arith.constant 0 : i32
    %c0_i32_0 = arith.constant 0 : i32
    %c0_i32_1 = arith.constant 0 : i32
    return %c0_i32, %c0_i32_0 : i32, i32
  }
  func.func @transform_2(%arg0: i32) -> (i32, i32) {
    %c0_i32 = arith.constant 0 : i32
    %c0_i32_0 = arith.constant 0 : i32
    %c0_i32_1 = arith.constant 0 : i32
    return %c0_i32, %c0_i32_0 : i32, i32
  }
  func.func @transform_3(%arg0: i32) -> (i32, i32) {
    %c0_i32 = arith.constant 0 : i32
    %c0_i32_0 = arith.constant 0 : i32
    return %arg0, %c0_i32 : i32, i32
  }
}

</mosaic_0001>

<bundles_post_ra>
// kernel: propagator_forward.1
= control target key start
LH: loop header
LB: loop body
LE: loop exit
PB: predicated region body
PF: predicated region fallthrough
CT: control target
= control target key end

     0   :  { %8 = vsyncpa [#allocation3], 0  ;;  %s585_s0 = inlined_call_operand.vmem [shape: f32[16,32], index: 0, kind: input, shape index: {}]   ;;  %s586_s1 = inlined_call_operand.vmem [shape: f32[32,32], index: 1, kind: input, shape index: {}]   ;;  %s587_s2 = inlined_call_operand.vmem [shape: f32[1,32], index: 2, kind: input, shape index: {}]   ;;  %s588_s3 = inlined_call_operand.hbm [shape: f32[16,32], index: 3, kind: output, shape index: {}]  }
   0x1   :  { %10 = vsyncpa [#allocation3 + $0x1], 0  ;;  %s481_s12 = smov 0   ;;  %s483_s13 = smov 0  }
   0x2   :  { %s485_s14 = smov 0   ;;  %s487_s15 = smov 0  }
   0x3 LB: > { %s502_s16 = sadd.s32 4294967295, %s456_s15   ;;  %s327_s17 = sadd.s32 4294967294, %s456_s15   ;;  %s456_s15 = sphi %s487_s15, %s594_s15   ;;  %s452_s14 = sphi %s485_s14, %s593_s14   ;;  %s448_s13 = sphi %s483_s13, %s592_s13   ;;  %s444_s12 = sphi %s481_s12, %s591_s12  }
   0x4   : > { %s506_s18 = sadd.s32 1, %s456_s15   ;;  %s91_s19 = sadd.s32 1, %s452_s14 }
   0x5   : > { %s88_s20 = ssub.s32 %s456_s15, %s506_s18  ;;  %p101_p0 = scmp.ne.s32.totalorder %s452_s14, %s448_s13 }
   0x6   : > { %p89_p1 = scmp.eq.s32.totalorder %s88_s20, 0  ;;  %p102_p2 = scmp.eq.s32.totalorder %s502_s16, 1 }
   0x7   : > { %p107_p3 = scmp.ne.s32.totalorder %s448_s13, %s444_s12  ;;  %p108_p4 = scmp.eq.s32.totalorder %s327_s17, 1 }
   0x8   : > { %s517_s21 = scalar_select %p89_p1, %s452_s14, %s91_s19  }
   0x9   : > { %p519_p5 = por %p102_p2, %p101_p0  ;;  %p523_p6 = por %p108_p4, %p107_p3 }
   0xa   : > { %p330_p7 = scmp.ge.s32.totalorder %s456_s15, 1  ;;  %p139_p8 = scmp.lt.s32.totalorder %s456_s15, 3 }
   0xc   : > { %p140_p9 = pnand %p330_p7, %p139_p8 }
   0xd   : > { %p162_p10 = scmp.lt.s32.totalorder (!%p140_p9), %s502_s16, 1  ;;  %s159_s10 = sand.u32 (!%p140_p9), 1, %s448_s13  }
   0xe   : > { %143 = sbr.rel (%p140_p9) target bundleno = 238 (0xee), region = 32  ;;  %s331_s11 = sshll.u32 (!%p140_p9), %s159_s10, 3 }
   0xf   : > { %s336_s20 = sshll.u32 (!%p140_p9), %s502_s16, 7  ;;  %s161_s24 = scalar_lea.vmem (!%p140_p9), [#allocation2], %s331_s11 }
  0x10   : > { %s268_s25 = sshll.u32 (!%p140_p9), %s161_s24, 4  ;;  %s255_s29 = scalar_lea.sflag (!%p140_p9), [#allocation3], %s159_s10  ;;  %s269_s25 = int_to_ptr.vmem [resolvable:$true] %s268_s25 }
  0x11   : > { %s396_s30 = scalar_lea.vmem (!%p140_p9), %s269_s25, 128 }
  0x12   : > { %p397_p11 = scmp.ne.s32.totalorder (!%p140_p9), %s269_s25, %s396_s30 }
  0x13   : > { %v170_v0 = vld [vmem:[%s586_s1 + $0x18] sm:$0xff]  ;;  %v458_v1 = vmov 0.0   ;;  %v169_v2 = vld [vmem:[%s586_s1 + $0x10] sm:$0xff]  ;;  %vm459_vm0 = vmmov 0   ;;  %s163_s28 = scalar_select %p162_p10, %s502_s16, 1  ;;  %v168_v3 = vld [vmem:[%s586_s1 + $0x8] sm:$0xff] }
  0x14   : > { %344 = vmatprep.subr.mxu0 %v458_v1  ;;  %352 = vmatprep.mubr.msk.f32.mxu0 %vm459_vm0, %v458_v1  ;;  %v167_v4 = vld [vmem:[%s586_s1] sm:$0xff]  ;;  %vm178_vm1 = vcmask 261120   ;;  %p398_p12 = pnand %p397_p11, %p519_p5 }
  0x15   : > { %345 = vmatpush3.msra.mxu0 %v170_v0  ;;  %s332_s4 = sshll.u32 %s163_s28, 3  ;;  %v333_v6 = vld [vmem:[%s587_s2] ss:$0 sm:$0xff]  ;;  %s266_s28 = scalar_lea.hbm %s588_s3, %s336_s20 }
  0x16   : > { %346 = vmatprep.subr.mxu0 %v458_v1  ;;  %s165_s9 = scalar_lea.vmem %s585_s0, %s332_s4  ;;  %p399_p13 = pneg %p398_p12 }
  0x17   : > { %347 = vmatpush3.msra.mxu0 %v169_v2  ;;  %v166_v5 = vld [vmem:[%s165_s9] sm:$0xff]  ;;  %s460_s4 = smov [#allocation2]  }
  0x18   : > { %348 = vmatprep.subr.mxu0 %v458_v1  ;;  %s400_s16 = sshll.u32 %s460_s4, 4  ;;  %s401_s16 = int_to_ptr.vmem [resolvable:$false] %s400_s16 }
  0x19   : > { %349 = vmatpush3.msra.mxu0 %v168_v3  ;;  %s402_s5 = scalar_lea.vmem %s401_s16, 256  ;;  %p403_p0 = scmp.lt.s32.totalorder %s269_s25, %s401_s16 }
  0x1a   : > { %350 = vmatprep.subr.mxu0 %v458_v1  ;;  %p404_p1 = scmp.lt.s32.totalorder %s402_s5, %s396_s30 }
  0x1b   : > { %351 = vmatpush3.msra.mxu0 %v167_v4 }
  0x1c   : > { %353 = vmatmul.mubr.msk.f32.vlgmr.msra.gmra.mxu0 %vm178_vm1, %v166_v5  ;;  %p405_p2 = por %p404_p1, %p403_p0 }
  0x1e   : > { %p406_p3 = pnand %p405_p2, %p399_p13 }
  0xdc   : > { %v248_v7 = vpop.f32.mrf.mxu0 }
  0xdd   : > { %v249_v8 = vadd.f32 %v333_v6, %v248_v7 }
  0xde   : > { %v354_v9 = vpop.f32.mrf.mxu0 }
  0xdf   : > { %v252_v10 = vmax.f32 %v249_v8, 0.0 }
  0xe1   : > { %253 = vst.msk [vmem:[%s161_s24] sm:$0xff] %vm178_vm1, %v252_v10 }
  0xe2   : > { %409 = shalt.err (!%p406_p3)
}
  0xe3   : > { %s410_s6 = scalar_lea.hbm %s266_s28, 128  ;;  %s414_s9 = scalar_lea.hbm %s588_s3, 256 }
  0xe4   : > { %p411_p4 = scmp.ne.s32.totalorder %s266_s28, %s410_s6  ;;  %p415_p9 = scmp.lt.s32.totalorder %s266_s28, %s588_s3 }
  0xe5   : > { %p416_p10 = scmp.lt.s32.totalorder %s414_s9, %s410_s6 }
  0xe6   : > { %p412_p7 = pnand %p411_p4, %p519_p5 }
  0xe7   : > { %p417_p11 = por %p416_p10, %p415_p9 }
  0xe8   : > { %p413_p8 = pneg %p412_p7 }
  0xea   : > { %p418_p12 = pnand %p417_p11, %p413_p8 }
  0xec   : > { %421 = shalt.err (!%p418_p12)
}
  0xed   : > { %355 = dma.vmem_to_hbm [thread:$0]  (%p519_p5), %s269_s25, 128, %s266_s28, %s255_s29  }
  0xee PF: > { %p361_p13 = scmp.ge.s32.totalorder %s456_s15, 2  ;;  %s280_s17 = sand.u32 1, %s444_s12  }
  0xef   : > { %s281_s19 = scalar_lea.sflag [#allocation3], %s280_s17 }
  0xf0   : > { %p358_p0 = pnand %p361_p13, %p523_p6 }
  0xf2   : > { %p359_p1 = pneg %p358_p0 }
  0xf4   : > { %439 = dma.done.wait (%p359_p1), %s281_s19, 128  }
  0xf5   : > { %441 = vsyncadd (%p359_p1), %s281_s19, 4294967168  ;;  %p13_p2 = scmp.ge.s32.totalorder %s506_s18, 4   ;;  %s591_s12 = smov %s448_s13 }
  0xf6   : > { %s592_s13 = smov %s452_s14  ;;  %s593_s14 = smov %s517_s21 }
  0xf7   : > { %s594_s15 = smov %s506_s18  ;;  %15 = sbr.rel (!%p13_p2) target bundleno = 3 (0x3), region = 67 }
  0xfc   :  { %286 = vsyncpa [#allocation3], 1 }
  0xfd   :  { %288 = vsyncpa [#allocation3 + $0x1], 1 }

</bundles_post_ra>
